<compile_context>
chip_gen: v7x
topology: tpu7x:2x2x1
jax: 0.10.0
libtpu: 0.0.40
codegen_flags: <defaults>
</compile_context>

<pallas_src>
import functools

import jax
import jax.numpy as jnp
from jax.experimental import pallas as pl
from jax.experimental.pallas import tpu as pltpu


def _round_up(x, m):
    return ((x + m - 1) // m) * m


def _vmem_capacity_bytes():
    """Per-TensorCore VMEM capacity (conservative per-generation)."""
    try:
        kind = jax.devices()[0].device_kind.lower()
    except Exception:
        kind = ""
    per_tc = (64 << 20) if ("7" in kind) else (128 << 20)  # v7x: 64 MiB/TC
    try:
        info = pltpu.get_tpu_info()
        cap = int(getattr(info, "vmem_capacity_bytes", 0) or 0)
        if cap:
            per_tc = min(per_tc, cap)
    except Exception:
        pass
    return per_tc


# ----------------------------------------------------------------------------
# Fused single-pass kernel (primary path).
# ----------------------------------------------------------------------------
def _afa_fused_kernel(inv_hw, hf_ref, lf_ref, w1lf_ref, w1hf_ref, b1_ref,
                      w2_ref, b2_ref, out_ref):
    # hf/lf/out blocks: (B_TILE, C, HW) in the native streaming dtype.
    # Spatial means (== mean over H, W in NCHW), accumulated in f32.
    lf_mean = jnp.sum(lf_ref[...].astype(jnp.float32), axis=-1) * inv_hw   # (B, C)
    hf_mean = jnp.sum(hf_ref[...].astype(jnp.float32), axis=-1) * inv_hw   # (B, C)

    # fc1: cat([lf_mean, hf_mean]) @ W1^T + b1 with W1^T pre-split by input half.
    h = (jnp.dot(lf_mean, w1lf_ref[...], preferred_element_type=jnp.float32)
         + jnp.dot(hf_mean, w1hf_ref[...], preferred_element_type=jnp.float32)
         + b1_ref[...])                                                    # (B, 2C)
    h = jnp.maximum(h, 0.0)                                                # ReLU

    # fc2 + sigmoid (lastrelu=False -> no second ReLU).
    att = jnp.dot(h, w2_ref[...], preferred_element_type=jnp.float32) + b2_ref[...]
    att = jax.nn.sigmoid(att).astype(out_ref.dtype)                        # (B, C)

    # out = lf * att + hf; fresh tile reads keep big live ranges short.
    out_ref[...] = lf_ref[...] * att[:, :, None] + hf_ref[...]


# ----------------------------------------------------------------------------
# Two-phase fallback (one (C, HW) row does not fit the VMEM budget).
# ----------------------------------------------------------------------------
def _afa_reduce_kernel(hw, hf_ref, lf_ref, hf_sum_ref, lf_sum_ref):
    h = pl.program_id(1)

    @pl.when(h == 0)
    def _():
        hf_sum_ref[...] = jnp.zeros_like(hf_sum_ref)
        lf_sum_ref[...] = jnp.zeros_like(lf_sum_ref)

    t = hf_ref.shape[-1]
    lane = jax.lax.broadcasted_iota(jnp.int32, (1, 1, t), 2)
    mask = (h * t + lane) < hw                       # drop out-of-bounds tail lanes
    hf_sum_ref[...] += jnp.sum(
        jnp.where(mask, hf_ref[...].astype(jnp.float32), 0.0),
        axis=-1, keepdims=True)
    lf_sum_ref[...] += jnp.sum(
        jnp.where(mask, lf_ref[...].astype(jnp.float32), 0.0),
        axis=-1, keepdims=True)


def _afa_apply_kernel(hf_ref, lf_ref, att_ref, out_ref):
    att = att_ref[...].astype(out_ref.dtype)         # (1, C, 1)
    out_ref[...] = lf_ref[...] * att + hf_ref[...]


def _afa_two_phase(hf3, lf3, w1, b1, w2, b2, N, C, H, W, budget, capacity):
    HW = H * W
    dtype = hf3.dtype
    itemsize = jnp.dtype(dtype).itemsize
    sublane = max(8, 32 // itemsize)
    c_pad = _round_up(C, sublane)
    c_pad_f32 = _round_up(C, 8)

    # Spatial tile: multiple of 128, sized so all double-buffered blocks plus
    # f32 intermediates fit the budget; use full HW if it already fits.
    per_128 = (6 * c_pad * itemsize + 3 * c_pad_f32 * 4) * 128
    t_budget = max(128, (budget // max(per_128, 1)) * 128)
    T = HW if t_budget >= HW else t_budget
    # TODO(synk): also tile the channel axis if a single (C, 128) slab already
    # exceeds the VMEM budget (only relevant for extremely large C).
    n_hw = pl.cdiv(HW, T)

    vmem_limit = int(min(
        max((6 * c_pad * itemsize + 3 * c_pad_f32 * 4) * T + (4 << 20), 32 << 20),
        (capacity * 9) // 10))

    # --- Phase A: per-(batch, channel) spatial sums --------------------------
    hf_sum, lf_sum = pl.pallas_call(
        functools.partial(_afa_reduce_kernel, HW),
        out_shape=(jax.ShapeDtypeStruct((N, C, 1), jnp.float32),
                   jax.ShapeDtypeStruct((N, C, 1), jnp.float32)),
        grid=(N, n_hw),
        in_specs=[
            pl.BlockSpec((1, C, T), lambda n, h: (n, 0, h)),   # hf
            pl.BlockSpec((1, C, T), lambda n, h: (n, 0, h)),   # lf
        ],
        out_specs=[
            pl.BlockSpec((1, C, 1), lambda n, h: (n, 0, 0)),
            pl.BlockSpec((1, C, 1), lambda n, h: (n, 0, 0)),
        ],
        compiler_params=pltpu.CompilerParams(
            dimension_semantics=("parallel", "arbitrary"),
            vmem_limit_bytes=vmem_limit,
        ),
    )(hf3, lf3)

    # --- Tiny (N, 2C) MLP: negligible bytes, plain JAX -----------------------
    inv_hw = 1.0 / float(HW)
    feat = jnp.concatenate([lf_sum[:, :, 0], hf_sum[:, :, 0]], axis=1) * inv_hw
    hmid = jnp.maximum(feat @ w1.astype(jnp.float32).T + b1.astype(jnp.float32), 0.0)
    att = jax.nn.sigmoid(hmid @ w2.astype(jnp.float32).T + b2.astype(jnp.float32))
    att3 = att[:, :, None]                                     # (N, C, 1) f32

    # --- Phase B: out = lf * att + hf ----------------------------------------
    out = pl.pallas_call(
        _afa_apply_kernel,
        out_shape=jax.ShapeDtypeStruct((N, C, HW), dtype),
        grid=(N, n_hw),
        in_specs=[
            pl.BlockSpec((1, C, T), lambda n, h: (n, 0, h)),   # hf
            pl.BlockSpec((1, C, T), lambda n, h: (n, 0, h)),   # lf
            pl.BlockSpec((1, C, 1), lambda n, h: (n, 0, 0)),   # att
        ],
        out_specs=pl.BlockSpec((1, C, T), lambda n, h: (n, 0, h)),
        compiler_params=pltpu.CompilerParams(
            dimension_semantics=("parallel", "parallel"),
            vmem_limit_bytes=vmem_limit,
        ),
    )(hf3, lf3, att3)

    return out.reshape(N, C, H, W)


# ----------------------------------------------------------------------------
# Wrapper
# ----------------------------------------------------------------------------
def afa_forward(hf, lf, w1, b1, w2, b2, *, vmem_budget_bytes=None):
    """hf, lf: (N, C, H, W). w1: (2C, 2C), b1: (2C,), w2: (C, 2C), b2: (C,)."""
    N, C, H, W = hf.shape
    HW = H * W
    HID = w1.shape[0]                                  # = 2C
    dtype = hf.dtype
    itemsize = jnp.dtype(dtype).itemsize

    # Free reshapes only — no pad, no astype, no post-slice.
    hf3 = hf.reshape(N, C, HW)
    lf3 = lf.reshape(N, C, HW)

    # --- VMEM accounting (sublane- and lane-padding aware) -------------------
    sublane = max(8, 32 // itemsize)                   # 8 f32 / 16 bf16 / 32 int8
    c_pad = _round_up(C, sublane)
    c_pad_f32 = _round_up(C, 8)
    hw_pad = _round_up(HW, 128)
    row_bytes = c_pad * hw_pad * itemsize              # one batch row, one array
    row_f32 = c_pad_f32 * hw_pad * 4                   # f32 intermediate headroom

    capacity = _vmem_capacity_bytes()
    if vmem_budget_bytes is None:
        vmem_budget_bytes = (capacity * 7) // 10
    weight_bytes = 4 * (2 * C * HID + HID * C + HID + C)
    budget = max(int(vmem_budget_bytes) - 2 * weight_bytes - (2 << 20), 0)

    # 3 streamed arrays (hf, lf, out) double-buffered + in-kernel f32 margin.
    per_row = 6 * row_bytes + 3 * row_f32

    if per_row > budget:
        # A single (C, HW) row overflows the budget -> two-phase fallback.
        return _afa_two_phase(hf3, lf3, w1, b1, w2, b2, N, C, H, W,
                              budget, capacity)

    # --- Fused single-pass path ----------------------------------------------
    b_tile = min(N, max(1, budget // per_row))
    if N >= 2:
        b_tile = min(b_tile, pl.cdiv(N, 2))            # >=2 grid steps (v7x megacore)
    n_steps = pl.cdiv(N, b_tile)                        # edge block may be partial

    vmem_limit = int(min(
        max(b_tile * per_row + 2 * weight_bytes + (2 << 20), 32 << 20),
        (capacity * 9) // 10))

    cost = pl.CostEstimate(
        flops=2 * N * (2 * C * HID + HID * C) + 2 * N * C * HW,
        transcendentals=N * C,
        bytes_accessed=3 * N * C * HW * itemsize,
    )

    # Small MLP params in f32; fc1 weight transposed and split by input half.
    w1_t = jnp.transpose(w1).astype(jnp.float32)        # (2C, 2C): in x out
    w1lf = w1_t[:C, :]                                  # (C, 2C)  (lf half first)
    w1hf = w1_t[C:, :]                                  # (C, 2C)
    w2_t = jnp.transpose(w2).astype(jnp.float32)        # (2C, C)
    b1_2d = b1.reshape(1, HID).astype(jnp.float32)
    b2_2d = b2.reshape(1, C).astype(jnp.float32)

    kernel = functools.partial(_afa_fused_kernel, 1.0 / float(HW))
    out = pl.pallas_call(
        kernel,
        out_shape=jax.ShapeDtypeStruct((N, C, HW), dtype),
        grid=(n_steps,),
        in_specs=[
            pl.BlockSpec((b_tile, C, HW), lambda n: (n, 0, 0)),   # hf
            pl.BlockSpec((b_tile, C, HW), lambda n: (n, 0, 0)),   # lf
            pl.BlockSpec((C, HID), lambda n: (0, 0)),             # W1^T lf half
            pl.BlockSpec((C, HID), lambda n: (0, 0)),             # W1^T hf half
            pl.BlockSpec((1, HID), lambda n: (0, 0)),             # b1
            pl.BlockSpec((HID, C), lambda n: (0, 0)),             # W2^T
            pl.BlockSpec((1, C), lambda n: (0, 0)),               # b2
        ],
        out_specs=pl.BlockSpec((b_tile, C, HW), lambda n: (n, 0, 0)),
        compiler_params=pltpu.CompilerParams(
            dimension_semantics=("parallel",),
            vmem_limit_bytes=vmem_limit,
        ),
        cost_estimate=cost,
    )(hf3, lf3, w1lf, w1hf, b1_2d, w2_t, b2_2d)

    return out.reshape(N, C, H, W)


# ----------------------------------------------------------------------------
# Reference + tests
# ----------------------------------------------------------------------------
def afa_reference(hf, lf, w1, b1, w2, b2):
    """Pure-JAX reference mirroring the PyTorch forward (lastrelu=False)."""
    att = jnp.concatenate([lf, hf], axis=1).mean(axis=(2, 3))          # (N, 2C)
    att = jnp.maximum(att @ w1.T + b1, 0.0)                            # fc1 + relu
    att = jax.nn.sigmoid(att @ w2.T + b2)                              # fc2 + sigmoid
    return lf * att[:, :, None, None] + hf


def _run_case(key, N, C, H, W, dtype=jnp.float32, vmem_budget_bytes=None,
              atol=1e-5, rtol=1e-5):
    HID = 2 * C
    k_hf, k_lf, k_w1, k_b1, k_w2, k_b2 = jax.random.split(key, 6)
    hf = jax.random.normal(k_hf, (N, C, H, W), dtype=jnp.float32).astype(dtype)
    lf = jax.random.normal(k_lf, (N, C, H, W), dtype=jnp.float32).astype(dtype)
    w1 = jax.random.normal(k_w1, (HID, 2 * C), dtype=jnp.float32) * 0.1
    b1 = jax.random.normal(k_b1, (HID,), dtype=jnp.float32) * 0.1
    w2 = jax.random.normal(k_w2, (C, HID), dtype=jnp.float32) * 0.1
    b2 = jax.random.normal(k_b2, (C,), dtype=jnp.float32) * 0.1

    out = jax.block_until_ready(
        afa_forward(hf, lf, w1, b1, w2, b2, vmem_budget_bytes=vmem_budget_bytes))
    ref = afa_reference(hf.astype(jnp.float32), lf.astype(jnp.float32),
                        w1, b1, w2, b2)
    assert out.shape == (N, C, H, W)
    assert out.dtype == dtype
    assert jnp.allclose(out.astype(jnp.float32), ref, atol=atol, rtol=rtol), \
        "mismatch vs reference"


if __name__ == "__main__":
    key = jax.random.PRNGKey(0)
    k0, k1, k2, k3 = jax.random.split(key, 4)

    # Canonical small case: H*W = 256 (lane-dense), grid of 2 steps.
    _run_case(k0, N=2, C=4, H=16, W=16)
    # Ragged case: H*W = 196 (masked tail stores) + N=3 partial-edge batch block.
    _run_case(k1, N=3, C=8, H=14, W=14)
    # bf16 streaming path (f32 upcast only for the reduction/MLP in-kernel).
    _run_case(k2, N=2, C=4, H=16, W=16, dtype=jnp.bfloat16, atol=1e-1, rtol=5e-2)
    # Tiny VMEM budget forces the two-phase (HW-tiled) fallback path.
    _run_case(k3, N=3, C=8, H=12, W=12, vmem_budget_bytes=1 << 20)

    print("KERNEL_OK")
</pallas_src>

<mosaic_0001>
module attributes {stable_mosaic.version = 11 : i64} {
  func.func @_afa_fused_kernel(%arg0: i32, %arg1: memref<1x4x256xf32, #tpu.memory_space<vmem>>, %arg2: memref<1x4x256xf32, #tpu.memory_space<vmem>>, %arg3: memref<4x8xf32, #tpu.memory_space<vmem>>, %arg4: memref<4x8xf32, #tpu.memory_space<vmem>>, %arg5: memref<1x8xf32, #tpu.memory_space<vmem>>, %arg6: memref<8x4xf32, #tpu.memory_space<vmem>>, %arg7: memref<1x4xf32, #tpu.memory_space<vmem>>, %arg8: memref<1x4x256xf32, #tpu.memory_space<vmem>>) attributes {dimension_semantics = [#tpu.dimension_semantics<parallel>], iteration_bounds = array<i64: 2>, scalar_prefetch = 0 : i64, scratch_operands = 0 : i64, tpu.core_type = #tpu.core_type<tc>, window_params = [{transform_indices = @transform_0, window_bounds = array<i64: 1, 4, 256>}, {transform_indices = @transform_1, window_bounds = array<i64: 1, 4, 256>}, {pipeline_mode = #tpu.pipeline_mode<synchronous>, transform_indices = @transform_2, window_bounds = array<i64: 4, 8>}, {pipeline_mode = #tpu.pipeline_mode<synchronous>, transform_indices = @transform_3, window_bounds = array<i64: 4, 8>}, {pipeline_mode = #tpu.pipeline_mode<synchronous>, transform_indices = @transform_4, window_bounds = array<i64: 1, 8>}, {pipeline_mode = #tpu.pipeline_mode<synchronous>, transform_indices = @transform_5, window_bounds = array<i64: 8, 4>}, {pipeline_mode = #tpu.pipeline_mode<synchronous>, transform_indices = @transform_6, window_bounds = array<i64: 1, 4>}, {transform_indices = @transform_7, window_bounds = array<i64: 1, 4, 256>}]} {
    %c0 = arith.constant 0 : index
    %c0_0 = arith.constant 0 : index
    %c0_1 = arith.constant 0 : index
    %0 = vector.load %arg2[%c0, %c0_0, %c0_1] : memref<1x4x256xf32, #tpu.memory_space<vmem>>, vector<1x4x256xf32>
    %cst = arith.constant dense<0.000000e+00> : vector<1x4xf32>
    %1 = vector.multi_reduction <add>, %0, %cst [2] : vector<1x4x256xf32> to vector<1x4xf32>
    %cst_2 = arith.constant 3.906250e-03 : f32
    %2 = vector.broadcast %cst_2 : f32 to vector<1x4xf32>
    %3 = arith.mulf %1, %2 : vector<1x4xf32>
    %c0_3 = arith.constant 0 : index
    %c0_4 = arith.constant 0 : index
    %c0_5 = arith.constant 0 : index
    %4 = vector.load %arg1[%c0_3, %c0_4, %c0_5] : memref<1x4x256xf32, #tpu.memory_space<vmem>>, vector<1x4x256xf32>
    %cst_6 = arith.constant dense<0.000000e+00> : vector<1x4xf32>
    %5 = vector.multi_reduction <add>, %4, %cst_6 [2] : vector<1x4x256xf32> to vector<1x4xf32>
    %cst_7 = arith.constant 3.906250e-03 : f32
    %6 = vector.broadcast %cst_7 : f32 to vector<1x4xf32>
    %7 = arith.mulf %5, %6 : vector<1x4xf32>
    %c0_8 = arith.constant 0 : index
    %c0_9 = arith.constant 0 : index
    %8 = vector.load %arg3[%c0_8, %c0_9] : memref<4x8xf32, #tpu.memory_space<vmem>>, vector<4x8xf32>
    %cst_10 = arith.constant dense<0.000000e+00> : vector<1x8xf32>
    %9 = tpu.matmul %3, %8, %cst_10 {dimension_numbers = #tpu.dot_dimension_numbers<[1], [0], [0], [1], [0, 0, 1, 1], [], []>} : vector<1x4xf32>, vector<4x8xf32>, vector<1x8xf32> -> vector<1x8xf32>
    %c0_11 = arith.constant 0 : index
    %c0_12 = arith.constant 0 : index
    %10 = vector.load %arg4[%c0_11, %c0_12] : memref<4x8xf32, #tpu.memory_space<vmem>>, vector<4x8xf32>
    %cst_13 = arith.constant dense<0.000000e+00> : vector<1x8xf32>
    %11 = tpu.matmul %7, %10, %cst_13 {dimension_numbers = #tpu.dot_dimension_numbers<[1], [0], [0], [1], [0, 0, 1, 1], [], []>} : vector<1x4xf32>, vector<4x8xf32>, vector<1x8xf32> -> vector<1x8xf32>
    %12 = arith.addf %9, %11 : vector<1x8xf32>
    %c0_14 = arith.constant 0 : index
    %c0_15 = arith.constant 0 : index
    %13 = vector.load %arg5[%c0_14, %c0_15] : memref<1x8xf32, #tpu.memory_space<vmem>>, vector<1x8xf32>
    %14 = arith.addf %12, %13 : vector<1x8xf32>
    %cst_16 = arith.constant 0.000000e+00 : f32
    %15 = vector.broadcast %cst_16 : f32 to vector<1x8xf32>
    %16 = arith.maximumf %14, %15 : vector<1x8xf32>
    %c0_17 = arith.constant 0 : index
    %c0_18 = arith.constant 0 : index
    %17 = vector.load %arg6[%c0_17, %c0_18] : memref<8x4xf32, #tpu.memory_space<vmem>>, vector<8x4xf32>
    %cst_19 = arith.constant dense<0.000000e+00> : vector<1x4xf32>
    %18 = tpu.matmul %16, %17, %cst_19 {dimension_numbers = #tpu.dot_dimension_numbers<[1], [0], [0], [1], [0, 0, 1, 1], [], []>} : vector<1x8xf32>, vector<8x4xf32>, vector<1x4xf32> -> vector<1x4xf32>
    %c0_20 = arith.constant 0 : index
    %c0_21 = arith.constant 0 : index
    %19 = vector.load %arg7[%c0_20, %c0_21] : memref<1x4xf32, #tpu.memory_space<vmem>>, vector<1x4xf32>
    %20 = arith.addf %18, %19 : vector<1x4xf32>
    %21 = arith.negf %20 : vector<1x4xf32>
    %22 = math.exp %21 : vector<1x4xf32>
    %cst_22 = arith.constant 1.000000e+00 : f32
    %23 = vector.broadcast %cst_22 : f32 to vector<1x4xf32>
    %24 = arith.addf %23, %22 : vector<1x4xf32>
    %25 = arith.divf %23, %24 : vector<1x4xf32>
    %c0_23 = arith.constant 0 : index
    %c0_24 = arith.constant 0 : index
    %c0_25 = arith.constant 0 : index
    %26 = vector.load %arg2[%c0_23, %c0_24, %c0_25] : memref<1x4x256xf32, #tpu.memory_space<vmem>>, vector<1x4x256xf32>
    %27 = vector.shape_cast %25 : vector<1x4xf32> to vector<1x4x1xf32>
    %28 = vector.broadcast %27 : vector<1x4x1xf32> to vector<1x4x256xf32>
    %29 = arith.mulf %26, %28 : vector<1x4x256xf32>
    %c0_26 = arith.constant 0 : index
    %c0_27 = arith.constant 0 : index
    %c0_28 = arith.constant 0 : index
    %30 = vector.load %arg1[%c0_26, %c0_27, %c0_28] : memref<1x4x256xf32, #tpu.memory_space<vmem>>, vector<1x4x256xf32>
    %31 = arith.addf %29, %30 : vector<1x4x256xf32>
    %c0_29 = arith.constant 0 : index
    %c0_30 = arith.constant 0 : index
    %c0_31 = arith.constant 0 : index
    %32 = vector.load %arg8[%c0_29, %c0_30, %c0_31] : memref<1x4x256xf32, #tpu.memory_space<vmem>>, vector<1x4x256xf32>
    tpu.vector_store %arg8[%c0_29, %c0_30, %c0_31], %31 {strides = array<i32>} : memref<1x4x256xf32, #tpu.memory_space<vmem>>, vector<1x4x256xf32>,
    return
  }
  func.func @transform_0(%arg0: i32) -> (i32, i32, i32) {
    %c0_i32 = arith.constant 0 : i32
    %c0_i32_0 = arith.constant 0 : i32
    %c0_i32_1 = arith.constant 0 : i32
    return %arg0, %c0_i32, %c0_i32_0 : i32, i32, i32
  }
  func.func @transform_1(%arg0: i32) -> (i32, i32, i32) {
    %c0_i32 = arith.constant 0 : i32
    %c0_i32_0 = arith.constant 0 : i32
    %c0_i32_1 = arith.constant 0 : i32
    return %arg0, %c0_i32, %c0_i32_0 : i32, i32, i32
  }
  func.func @transform_2(%arg0: i32) -> (i32, i32) {
    %c0_i32 = arith.constant 0 : i32
    %c0_i32_0 = arith.constant 0 : i32
    %c0_i32_1 = arith.constant 0 : i32
    return %c0_i32, %c0_i32_0 : i32, i32
  }
  func.func @transform_3(%arg0: i32) -> (i32, i32) {
    %c0_i32 = arith.constant 0 : i32
    %c0_i32_0 = arith.constant 0 : i32
    %c0_i32_1 = arith.constant 0 : i32
    return %c0_i32, %c0_i32_0 : i32, i32
  }
  func.func @transform_4(%arg0: i32) -> (i32, i32) {
    %c0_i32 = arith.constant 0 : i32
    %c0_i32_0 = arith.constant 0 : i32
    %c0_i32_1 = arith.constant 0 : i32
    return %c0_i32, %c0_i32_0 : i32, i32
  }
  func.func @transform_5(%arg0: i32) -> (i32, i32) {
    %c0_i32 = arith.constant 0 : i32
    %c0_i32_0 = arith.constant 0 : i32
    %c0_i32_1 = arith.constant 0 : i32
    return %c0_i32, %c0_i32_0 : i32, i32
  }
  func.func @transform_6(%arg0: i32) -> (i32, i32) {
    %c0_i32 = arith.constant 0 : i32
    %c0_i32_0 = arith.constant 0 : i32
    %c0_i32_1 = arith.constant 0 : i32
    return %c0_i32, %c0_i32_0 : i32, i32
  }
  func.func @transform_7(%arg0: i32) -> (i32, i32, i32) {
    %c0_i32 = arith.constant 0 : i32
    %c0_i32_0 = arith.constant 0 : i32
    %c0_i32_1 = arith.constant 0 : i32
    return %arg0, %c0_i32, %c0_i32_0 : i32, i32, i32
  }
}

</mosaic_0001>

<bundles_post_ra>
// kernel: tpu_custom_call.1
= control target key start
LH: loop header
LB: loop body
LE: loop exit
PB: predicated region body
PF: predicated region fallthrough
CT: control target
= control target key end

     0   :  { %s1267_s0 = inlined_call_operand.hbm [shape: f32[2,4,256], index: 0, kind: input, shape index: {}]   ;;  %s1268_s1 = inlined_call_operand.hbm [shape: f32[2,4,256], index: 1, kind: input, shape index: {}]   ;;  %s1269_s2 = inlined_call_operand.vmem [shape: f32[4,8], index: 2, kind: input, shape index: {}]   ;;  %s1270_s3 = inlined_call_operand.vmem [shape: f32[4,8], index: 3, kind: input, shape index: {}]   ;;  %s1271_s4 = inlined_call_operand.vmem [shape: f32[1,8], index: 4, kind: input, shape index: {}]   ;;  %s1272_s5 = inlined_call_operand.vmem [shape: f32[8,4], index: 5, kind: input, shape index: {}]   ;;  %s1273_s6 = inlined_call_operand.vmem [shape: f32[1,4], index: 6, kind: input, shape index: {}]   ;;  %s1274_s7 = inlined_call_operand.hbm [shape: f32[2,4,256], index: 7, kind: output, shape index: {}]  }
   0x1   :  { %1278 = sst [smem:[#allocation11_spill]] %s1267_s0 }
   0x2   :  { %12 = vsyncpa [#allocation3], 0 }
   0x3   :  { %14 = vsyncpa [#allocation3 + $0x1], 0 }
   0x4   :  { %15 = vsyncpa [#allocation6], 0 }
   0x5   :  { %17 = vsyncpa [#allocation6 + $0x1], 0 }
   0x6   :  { %18 = vsyncpa [#allocation4], 0 }
   0x7   :  { %20 = vsyncpa [#allocation4 + $0x1], 0  ;;  %s1017_s24 = smov 0   ;;  %s1019_s25 = smov 0  }
   0x8   :  { %s1021_s26 = smov 0   ;;  %s1023_s27 = smov 0  }
   0x9 LB: > { %s1038_s28 = sadd.s32 4294967295, %s969_s27   ;;  %s731_s29 = sadd.s32 4294967294, %s969_s27   ;;  %s969_s27 = sphi %s1023_s27, %s1297_s27   ;;  %s965_s26 = sphi %s1021_s26, %s1296_s26   ;;  %s961_s25 = sphi %s1019_s25, %s1295_s25   ;;  %s957_s24 = sphi %s1017_s24, %s1294_s24  }
   0xa   : > { %s1042_s30 = sadd.s32 1, %s969_s27   ;;  %s33_s8 = sadd.s32 1, %s965_s26 }
   0xb   : > { %s30_s9 = ssub.s32 %s969_s27, %s1042_s30  ;;  %p40_p0 = scmp.ne.s32.totalorder %s965_s26, %s961_s25 }
   0xc   : > { %p31_p1 = scmp.eq.s32.totalorder %s30_s9, 0  ;;  %p41_p2 = scmp.eq.s32.totalorder %s969_s27, 0 }
   0xd   : > { %p46_p3 = scmp.ne.s32.totalorder %s961_s25, %s957_s24  ;;  %p47_p4 = scmp.eq.s32.totalorder %s1038_s28, 0 }
   0xe   : > { %s1054_s10 = scalar_select %p31_p1, %s965_s26, %s33_s8  }
   0xf   : > { %p1056_p5 = por %p41_p2, %p40_p0  ;;  %p1060_p6 = por %p47_p4, %p46_p3 }
  0x10   : > { %p201_p7 = scmp.eq.s32.totalorder %s1038_s28, 1  ;;  %p207_p8 = scmp.eq.s32.totalorder %s731_s29, 1 }
  0x11   : > { %s1280_s12 = scalar_select %p1060_p6, 1, 0 }
  0x12   : > { %p796_p10 = scmp.lt.s32.totalorder %s969_s27, 2  ;;  %p1067_p11 = por %p201_p7, %p40_p0 }
  0x13   : > { %p1071_p12 = por %p207_p8, %p46_p3  ;;  %s1076_s15 = sand.u32 1, %s965_s26  }
  0x14   : > { %s1281_s13 = scalar_select %p1067_p11, 1, 0 }
  0x15   : > { %s1282_s14 = scalar_select %p1071_p12, 1, 0 }
  0x16   : > { %s755_s16 = sshll.u32 %s969_s27, 7  ;;  %s1275_s17 = sshll.u32 %s1076_s15, 3 }
  0x17   : > { %s1283_s0 = sld [smem:[#allocation11_spill]]  ;;  %s246_s21 = scalar_lea.vmem [#allocation2], %s1275_s17 }
  0x18   : > { %s254_s22 = sshll.u32 %s246_s21, 4  ;;  %p1091_p13 = pnand %p796_p10, %p1056_p5  ;;  %s1095_s22 = int_to_ptr.vmem [resolvable:$true] %s254_s22 }
  0x19   : > { %s243_s29 = scalar_lea.sflag [#allocation3], %s1076_s15 }
  0x1a   : > { %p841_p3 = pneg %p1091_p13 }
  0x1d   : > { %s1085_s20 = scalar_lea.hbm %s1283_s0, %s755_s16  ;;  %s844_s18 = scalar_lea.hbm %s1283_s0, 256 }
  0x1e   : > { %s839_s8 = scalar_lea.hbm %s1085_s20, 128  ;;  %p845_p5 = scmp.lt.u32.totalorder %s1085_s20, %s1283_s0 }
  0x1f   : > { %p840_p2 = scmp.ne.s32.totalorder %s1085_s20, %s839_s8  ;;  %p846_p8 = scmp.lt.u32.totalorder %s844_s18, %s839_s8 }
  0x20   : > { %p848_p9 = scmp.lt.u32.totalorder %s839_s8, %s1085_s20 }
  0x21   : > { %p842_p4 = pnand %p841_p3, %p840_p2  ;;  %p847_p10 = por %p846_p8, %p845_p5 }
  0x23   : > { %p843_p7 = pneg %p842_p4  ;;  %p849_p0 = por %p848_p9, %p847_p10 }
  0x25   : > { %p850_p1 = pnand %p849_p0, %p843_p7 }
  0x27   : > { %853 = shalt.err (!%p850_p1)
}
  0x28   : > { %s854_s17 = scalar_lea.vmem %s1095_s22, 128  ;;  %s971_s9 = smov [#allocation2]  }
  0x29   : > { %p855_p2 = scmp.ne.s32.totalorder %s1095_s22, %s854_s17  ;;  %s859_s11 = sshll.u32 %s971_s9, 4  ;;  %s860_s11 = int_to_ptr.vmem [resolvable:$false] %s859_s11 }
  0x2a   : > { %s861_s19 = scalar_lea.vmem %s860_s11, 256  ;;  %p862_p11 = scmp.lt.s32.totalorder %s1095_s22, %s860_s11 }
  0x2b   : > { %p857_p4 = pnand %p855_p2, %p841_p3  ;;  %p863_p5 = scmp.lt.s32.totalorder %s861_s19, %s854_s17 }
  0x2d   : > { %p858_p12 = pneg %p857_p4  ;;  %p864_p8 = por %p863_p5, %p862_p11 }
  0x2f   : > { %p865_p9 = pnand %p864_p8, %p858_p12 }
  0x31   : > { %868 = shalt.err (!%p865_p9)
}
  0x32   : > { %788 = dma.hbm_to_vmem [thread:$0]  (!%p1091_p13), %s1085_s20, 128, %s1095_s22, %s243_s29  }
  0x33   : > { %p1285_p0 = scmp.lt.s32.totalorder %s969_s27, 3  ;;  %p1286_p1 = scmp.ge.s32.totalorder %s969_s27, 1 }
  0x34   : > { %s1138_s21 = scalar_lea.hbm %s1268_s1, %s755_s16  ;;  %s1288_s9 = sshll.u32 %s1076_s15, 3 }
  0x35   : > { %p1129_p7 = pnand %p1286_p1, %p1285_p0  ;;  %s265_s11 = scalar_lea.vmem [#allocation5], %s1288_s9 }
  0x36   : > { %s273_s19 = sshll.u32 %s265_s11, 4  ;;  %s262_s20 = scalar_lea.sflag [#allocation6], %s1076_s15  ;;  %s274_s19 = int_to_ptr.vmem [resolvable:$true] %s273_s19 }
  0x37   : > { %s1287_s8 = scalar_select %p1129_p7, 1, 0 }
  0x38   : > { %s869_s22 = scalar_lea.hbm %s1138_s21, 128  ;;  %s874_s16 = scalar_lea.hbm %s1268_s1, 256 }
  0x39   : > { %p870_p11 = scmp.ne.s32.totalorder %s1138_s21, %s869_s22  ;;  %p875_p2 = scmp.lt.u32.totalorder %s1138_s21, %s1268_s1 }
  0x3a   : > { %p876_p4 = scmp.lt.u32.totalorder %s874_s16, %s869_s22  ;;  %p878_p8 = scmp.lt.u32.totalorder %s869_s22, %s1138_s21 }
  0x3b   : > { %p872_p12 = pnand %p870_p11, %p841_p3 }
  0x3c   : > { %p877_p5 = por %p876_p4, %p875_p2 }
  0x3d   : > { %p873_p10 = pneg %p872_p12 }
  0x3e   : > { %p879_p9 = por %p878_p8, %p877_p5 }
  0x40   : > { %p880_p0 = pnand %p879_p9, %p873_p10 }
  0x42   : > { %883 = shalt.err (!%p880_p0)
}
  0x43   : > { %s884_s15 = scalar_lea.vmem %s274_s19, 128  ;;  %s972_s9 = smov [#allocation5]  }
  0x44   : > { %p885_p1 = scmp.ne.s32.totalorder %s274_s19, %s884_s15  ;;  %s889_s0 = sshll.u32 %s972_s9, 4  ;;  %s890_s0 = int_to_ptr.vmem [resolvable:$false] %s889_s0 }
  0x45   : > { %s891_s11 = scalar_lea.vmem %s890_s0, 256  ;;  %p892_p6 = scmp.lt.s32.totalorder %s274_s19, %s890_s0 }
  0x46   : > { %p887_p11 = pnand %p885_p1, %p841_p3  ;;  %p893_p7 = scmp.lt.s32.totalorder %s891_s11, %s884_s15 }
  0x48   : > { %p888_p12 = pneg %p887_p11  ;;  %p894_p2 = por %p893_p7, %p892_p6 }
  0x4a   : > { %p895_p4 = pnand %p894_p2, %p888_p12 }
  0x4c   : > { %898 = shalt.err (!%p895_p4)
}
  0x4d   : > { %791 = dma.hbm_to_vmem [thread:$0]  (!%p1091_p13), %s1138_s21, 128, %s274_s19, %s262_s20  }
  0x4e   : > { %p1289_p10 = scmp.ne.s32.totalorder %s1287_s8, 0 }
  0x4f   : > { %s1165_s22 = sand.u32 (!%p1289_p10), 1, %s961_s25   ;;  %p1290_p6 = scmp.ne.s32.totalorder (!%p1289_p10), %s1280_s12, 0 }
  0x50   : > { %282 = sbr.rel (%p1289_p10) target bundleno = 841 (0x349), region = 48  ;;  %s1168_s29 = sshll.u32 (!%p1289_p10), %s1165_s22, 3 }
  0x51   : > { %s285_s16 = scalar_lea.sflag (!%p1289_p10), [#allocation3], %s1165_s22  ;;  %s288_s17 = scalar_lea.vmem (!%p1289_p10), [#allocation2], %s1168_s29 }
  0x57   : > { %944 = dma.done.wait (%p1290_p6), %s285_s16, 128  }
  0x58   : > { %946 = vsyncadd (%p1290_p6), %s285_s16, 4294967168  ;;  %s294_s23 = scalar_lea.sflag [#allocation6], %s1165_s22  ;;  %s297_s8 = scalar_lea.vmem [#allocation5], %s1168_s29 }
  0x59   : > { %948 = dma.done.wait (%p1290_p6), %s294_s23, 128  }
  0x5a   : > { %950 = vsyncadd (%p1290_p6), %s294_s23, 4294967168  ;;  %vm337_vm0 = vcmask 1043456   ;;  %v1182_v0 = vld [vmem:[%s297_s8] sm:$0xff]  ;;  %v1184_v1 = vld [vmem:[%s288_s17] sm:$0xff]  ;;  %v973_v10 = vmov 0.0   ;;  %vm974_vm1 = vmmov 0   ;;  %v357_v13 = vlaneseq }
  0x5b   : > { %v335_v2 = vcombine.high %v1182_v0, %v1182_v0  ;;  %v338_v3 = vsel %vm337_vm0, %v1182_v0, 0.0  ;;  %v346_v4 = vcombine.high %v1184_v1, %v1184_v1  ;;  %v348_v6 = vsel %vm337_vm0, %v1184_v1, 0.0  ;;  %769 = vmatprep.subr.mxu1 %v973_v10  ;;  %v354_v11 = vld [vmem:[%s1269_s2] sm:$0xf]  ;;  %764 = vmatprep.subr.mxu0 %v973_v10  ;;  %s757_s17 = sshll.u32 %s1038_s28, 7  ;;  %s332_s23 = scalar_lea.vmem [#allocation7], %s1168_s29 }
  0x5c   : > { %770 = vmatpush3.msk.msra.mxu1 %vm337_vm0, %v354_v11  ;;  %771 = vmatprep.mubr.msk.f32.mxu1 %vm974_vm1, %v973_v10  ;;  %v355_v12 = vld [vmem:[%s1270_s3] sm:$0xf]  ;;  %v358_v14 = vand.u32 127, %v357_v13  ;;  %v360_v15 = vshrl.u32 %v357_v13, 7  ;;  %vm363_vm2 = vcmask 31744   ;;  %vm524_vm3 = vcmask 64512   ;;  %s1223_s19 = scalar_lea.hbm %s1274_s7, %s757_s17 }
  0x5d   : > { %v339_v5 = vsel %vm337_vm0, %v335_v2, 0.0  ;;  %v349_v7 = vsel %vm337_vm0, %v346_v4, 0.0  ;;  %766 = vmatprep.mubr.msk.f32.mxu0 %vm974_vm1, %v973_v10  ;;  %765 = vmatpush3.msk.msra.mxu0 %vm337_vm0, %v355_v12  ;;  %v522_v23 = vld [vmem:[%s1272_s5] sm:$0xff]  ;;  %v975_v42 = vmov 839922192   ;;  %s638_s8 = sshll.u32 %s332_s23, 4  ;;  %s1225_s8 = int_to_ptr.vmem [resolvable:$true] %s638_s8 }
  0x5e   : > { %v340_v8 = vadd.f32 %v339_v5, %v338_v3  ;;  %v350_v9 = vadd.f32 %v349_v7, %v348_v6  ;;  %774 = vmatprep.subr.mxu0 %v973_v10  ;;  %v361_v16 = vsub.s32 %v358_v14, %v360_v15  ;;  %v519_v27 = vld [vmem:[%s1271_s4] sm:$0x1]  ;;  %v606_v39 = vsub.s32 0, %v360_v15  ;;  %s624_s20 = scalar_lea.sflag [#allocation4], %s1165_s22  ;;  %s899_s18 = scalar_lea.vmem %s1225_s8, 128 }
  0x5f   : > { %v523_v32 = vld [vmem:[%s1273_s6] sm:$0x1]  ;;  %v613_v43 = vunpack.c.l.s4 %v975_v42  ;;  %p900_p13 = scmp.ne.s32.totalorder %s1225_s8, %s899_s18  ;;  %p1291_p3 = scmp.ne.s32.totalorder %s1281_s13, 0 }
  0x60   : > { %341 = vadd.xlane.f32.xlu0 %v340_v8  ;;  %s976_s28 = smov [#allocation7]  }
  0x61   : > { %v614_v44 = vunpack.c.0.s8 %v613_v43  ;;  %p901_p7 = pnand %p900_p13, %p1291_p3  ;;  %s903_s29 = sshll.u32 %s976_s28, 4  ;;  %s904_s29 = int_to_ptr.vmem [resolvable:$false] %s903_s29 }
  0x62   : > { %s905_s15 = scalar_lea.vmem %s904_s29, 256  ;;  %p906_p8 = scmp.lt.s32.totalorder %s1225_s8, %s904_s29 }
  0x63   : > { %v617_v45 = vsub.s32 %v614_v44, %v360_v15  ;;  %p902_p5 = pneg %p901_p7  ;;  %p907_p9 = scmp.lt.s32.totalorder %s905_s15, %s899_s18 }
  0x64   : > { %351 = vadd.xlane.f32.xlu0 %v350_v9 }
  0x65   : > { %p908_p0 = por %p907_p9, %p906_p8 }
  0x67   : > { %p909_p1 = pnand %p908_p0, %p902_p5 }
  0xed   : > { %v342_v17 = vpop.xlane.xlu0 %341 }
  0xee   : > { %v343_v18 = vmul.f32 0.00390625, %v342_v17 }
  0xf0   : > { %v443_v19 = vrot.slane %v343_v18, %v361_v16 }
  0xf1   : > { %v352_v20 = vpop.xlane.xlu0 %351 }
  0xf2   : > { %v353_v21 = vmul.f32 0.00390625, %v352_v20  ;;  %772 = vmatmul.mubr.msk.f32.vlgmr.msra.gmra.mrb[0].mxu1 %vm363_vm2, %v443_v19 }
  0xf4   : > { %v362_v22 = vrot.slane %v353_v21, %v361_v16 }
  0xf6   : > { %767 = vmatmul.mubr.msk.f32.vlgmr.msra.gmra.mrb[0].mxu0 %vm363_vm2, %v362_v22 }
  0xf7   : > { %776 = vmatprep.mubr.msk.f32.mxu0 %vm974_vm1, %v973_v10  ;;  %775 = vmatpush3.msra.mxu0 %v522_v23 }
 0x1c5   : > { %v515_v24 = vpop.f32.mrb[0].mxu1 }
 0x1c6   : > { %v773_v25 = vpop.f32.mrb[1].mxu1 }
 0x1c9   : > { %v435_v26 = vpop.f32.mrb[0].mxu0 }
 0x1ca   : > { %v516_v28 = vadd.f32 %v515_v24, %v435_v26  ;;  %v768_v29 = vpop.f32.mrb[1].mxu0 }
 0x1cc   : > { %v520_v30 = vadd.f32 %v519_v27, %v516_v28 }
 0x1ce   : > { %v521_v31 = vmax.f32 %v520_v30, 0.0 }
 0x1d0   : > { %777 = vmatmul.mubr.msk.f32.vlgmr.msra.gmra.mrb[2].mxu0 %vm524_vm3, %v521_v31 }
 0x2a3   : > { %v594_v33 = vpop.f32.mrb[2].mxu0 }
 0x2a4   : > { %v595_v34 = vadd.f32 %v594_v33, %v523_v32  ;;  %v778_v35 = vpop.f32.mrb[3].mxu0 }
 0x2a6   : > { %v749_v36 = vmul.f32 -1.442695, %v595_v34 }
 0x2a8   : > { %835 = vpow2.f32 %v749_v36 }
 0x2b2   : > { %v836_v37 = vpop.eup %835 }
 0x2b3   : > { %v601_v38 = vadd.f32 1.0, %v836_v37 }
 0x2b5   : > { %837 = vrcp.f32 %v601_v38 }
 0x2bf   : > { %v838_v40 = vpop.eup %837 }
 0x2c0   : > { %v607_v41 = vrot.slane %v838_v40, %v606_v39 }
 0x2c2   : > { %609 = vbcast.lane.b32.xlu1 %v607_v41, 256 }
 0x334   : > { %v610_v46 = vpop.permute.xlu1 %609 }
 0x335   : > { %v618_v47 = vrot.slane %v610_v46, %v617_v45 }
 0x337   : > { %v620_v48 = vmul.f32 %v618_v47, %v1182_v0 }
 0x339   : > { %v621_v49 = vadd.f32 %v620_v48, %v1184_v1 }
 0x33b   : > { %622 = vst [vmem:[%s332_s23] sm:$0xff] %v621_v49 }
 0x33c   : > { %912 = shalt.err (!%p909_p1)
}
 0x33d   : > { %s913_s22 = scalar_lea.hbm %s1223_s19, 128  ;;  %s917_s11 = scalar_lea.hbm %s1274_s7, 256 }
 0x33e   : > { %p914_p11 = scmp.ne.s32.totalorder %s1223_s19, %s913_s22  ;;  %p918_p4 = scmp.lt.u32.totalorder %s1223_s19, %s1274_s7 }
 0x33f   : > { %p919_p10 = scmp.lt.u32.totalorder %s917_s11, %s913_s22  ;;  %p921_p13 = scmp.lt.u32.totalorder %s913_s22, %s1223_s19 }
 0x340   : > { %p915_p12 = pnand %p914_p11, %p1291_p3 }
 0x341   : > { %p920_p6 = por %p919_p10, %p918_p4 }
 0x342   : > { %p916_p2 = pneg %p915_p12 }
 0x343   : > { %p922_p7 = por %p921_p13, %p920_p6 }
 0x345   : > { %p923_p5 = pnand %p922_p7, %p916_p2 }
 0x347   : > { %926 = shalt.err (!%p923_p5)
}
 0x348   : > { %783 = dma.vmem_to_hbm [thread:$0]  (%p1291_p3), %s1225_s8, 128, %s1223_s19, %s624_s20  }
 0x349 PF: > { %s650_s23 = sand.u32 1, %s957_s24   ;;  %p1292_p8 = scmp.ne.s32.totalorder %s1282_s14, 0 }
 0x34a   : > { %p1293_p9 = scmp.ge.s32.totalorder %s969_s27, 2  ;;  %s651_s12 = scalar_lea.sflag [#allocation4], %s650_s23 }
 0x34c   : > { %p793_p0 = pnand %p1293_p9, %p1292_p8 }
 0x34e   : > { %952 = dma.done.wait (!%p793_p0), %s651_s12, 128  }
 0x34f   : > { %954 = vsyncadd (!%p793_p0), %s651_s12, 4294967168  ;;  %p23_p1 = scmp.ge.s32.totalorder %s1042_s30, 4   ;;  %s1294_s24 = smov %s961_s25 }
 0x350   : > { %s1295_s25 = smov %s965_s26  ;;  %s1296_s26 = smov %s1054_s10 }
 0x351   : > { %s1297_s27 = smov %s1042_s30  ;;  %25 = sbr.rel (!%p23_p1) target bundleno = 9 (0x9), region = 106 }
 0x358   :  { %656 = vsyncpa [#allocation3], 1 }
 0x359   :  { %658 = vsyncpa [#allocation3 + $0x1], 1 }
 0x35a   :  { %659 = vsyncpa [#allocation6], 1 }
 0x35b   :  { %661 = vsyncpa [#allocation6 + $0x1], 1 }
 0x35c   :  { %662 = vsyncpa [#allocation4], 1 }
 0x35d   :  { %664 = vsyncpa [#allocation4 + $0x1], 1 }

</bundles_post_ra>
